<compile_context>
chip_gen: v6e
topology: v6e:2x2x1
jax: 0.10.0
libtpu: 0.0.40
codegen_flags: <defaults>
</compile_context>

<pallas_src>
import functools

import jax
import jax.numpy as jnp
from jax.experimental import pallas as pl
from jax.experimental.pallas import tpu as pltpu


def _round_up(x, m):
    return (x + m - 1) // m * m


def _prep_m_kernel(pt_ref, a_ref, m_ref):
    """One-shot: M = P.T @ triu(A, 1).  pt_ref already holds P transposed."""
    a = a_ref[...]
    d = a.shape[0]
    row = jax.lax.broadcasted_iota(jnp.int32, (d, d), 0)
    col = jax.lax.broadcasted_iota(jnp.int32, (d, d), 1)
    a_ut = jnp.where(row < col, a, jnp.zeros_like(a))  # triu(A, diagonal=1)
    m_ref[...] = jnp.dot(
        pt_ref[...], a_ut, preferred_element_type=jnp.float32
    ).astype(m_ref.dtype)


def _xm_kernel(x_ref, m_ref, o_ref):
    """One row-tile of out = X @ M (M stays resident across the grid)."""
    o_ref[...] = jnp.dot(
        x_ref[...], m_ref[...], preferred_element_type=jnp.float32
    ).astype(o_ref.dtype)


def _pick_tile_n(n_rows, dim_p, budget_bytes=12 << 20, tile_cap=1024):
    # 4 fp32 row-buffers of width dim_p (double-buffered X tile + out tile)
    # plus the resident M (counted double-buffered to be conservative).
    per_row = 4 * dim_p * 4
    resident = 2 * dim_p * dim_p * 4
    avail = max(budget_bytes - resident, 8 * per_row)
    t = min(tile_cap, n_rows, avail // per_row)
    return max(8, (t // 8) * 8)


@functools.partial(jax.jit, static_argnames=("tile_cap",))
def notears_perm_forward(X, P, A, *, tile_cap=1024):
    N, dim = X.shape
    assert P.shape == (dim, dim) and A.shape == (dim, dim)

    # Pad the feature axis to a multiple of 128 lanes (lane-dense loads/stores),
    # and the row axis up to a whole number of tiles.
    dim_p = _round_up(dim, 128)
    tile_n = _pick_tile_n(_round_up(N, 8), dim_p, tile_cap=tile_cap)
    n_p = _round_up(N, tile_n)

    x_p = jnp.zeros((n_p, dim_p), X.dtype).at[:N, :dim].set(X)
    a_p = (
        jnp.zeros((dim_p, dim_p), jnp.float32)
        .at[:dim, :dim].set(A.astype(jnp.float32))
    )
    # Transpose P once in the wrapper; no in-kernel XLU transpose.
    pt_p = (
        jnp.zeros((dim_p, dim_p), jnp.float32)
        .at[:dim, :dim].set(P.astype(jnp.float32).T)
    )

    # One-shot (dim_p, dim_p) kernel: M = P.T @ triu(A, 1).
    m = pl.pallas_call(
        _prep_m_kernel,
        out_shape=jax.ShapeDtypeStruct((dim_p, dim_p), jnp.float32),
        in_specs=[
            pl.BlockSpec((dim_p, dim_p), lambda: (0, 0)),
            pl.BlockSpec((dim_p, dim_p), lambda: (0, 0)),
        ],
        out_specs=pl.BlockSpec((dim_p, dim_p), lambda: (0, 0)),
    )(pt_p, a_p)

    # Main streamed matmul: out = X @ M, tiled over rows of X, M resident.
    grid = (n_p // tile_n,)
    out_p = pl.pallas_call(
        _xm_kernel,
        out_shape=jax.ShapeDtypeStruct((n_p, dim_p), X.dtype),
        grid_spec=pltpu.PrefetchScalarGridSpec(
            num_scalar_prefetch=0,
            grid=grid,
            in_specs=[
                pl.BlockSpec((tile_n, dim_p), lambda i: (i, 0)),
                pl.BlockSpec((dim_p, dim_p), lambda i: (0, 0)),
            ],
            out_specs=pl.BlockSpec((tile_n, dim_p), lambda i: (i, 0)),
        ),
        compiler_params=pltpu.CompilerParams(
            dimension_semantics=("parallel",),
        ),
    )(x_p, m)

    return out_p[:N, :dim]


if __name__ == "__main__":
    # Small shapes consistent with the module: X is (N, dim).
    N, dim = 8, 32

    key = jax.random.PRNGKey(0)
    kx, ka, kp = jax.random.split(key, 3)

    X = jax.random.normal(kx, (N, dim), dtype=jnp.float32)
    # Deterministic parameter init mirroring nn.Parameter(torch.randn(...)) /
    # torch.abs(torch.randn(...)).
    A = jax.random.normal(ka, (dim, dim), dtype=jnp.float32)
    P = jnp.abs(jax.random.normal(kp, (dim, dim), dtype=jnp.float32))

    out = notears_perm_forward(X, P, A)
    out = jax.block_until_ready(out)

    # Pure-JAX reference check of the fused math.
    ref = (X @ P.T) @ jnp.triu(A, k=1)
    assert out.shape == (N, dim)
    assert jnp.allclose(out, ref, atol=1e-4, rtol=1e-4)

    # Larger N exercising the tiled / parallel-grid path.
    N2 = 4096
    X2 = jax.random.normal(kx, (N2, dim), dtype=jnp.float32)
    out2 = jax.block_until_ready(notears_perm_forward(X2, P, A))
    ref2 = (X2 @ P.T) @ jnp.triu(A, k=1)
    assert out2.shape == (N2, dim)
    assert jnp.allclose(out2, ref2, atol=1e-3, rtol=1e-3)

    print("KERNEL_OK")
</pallas_src>

<mosaic_0001>
module attributes {stable_mosaic.version = 11 : i64} {
  func.func @_prep_m_kernel(%arg0: memref<128x128xf32, #tpu.memory_space<vmem>>, %arg1: memref<128x128xf32, #tpu.memory_space<vmem>>, %arg2: memref<128x128xf32, #tpu.memory_space<vmem>>) attributes {dimension_semantics = [], scalar_prefetch = 0 : i64, scratch_operands = 0 : i64, tpu.core_type = #tpu.core_type<tc>} {
    %c0 = arith.constant 0 : index
    %c0_0 = arith.constant 0 : index
    %0 = vector.load %arg1[%c0, %c0_0] : memref<128x128xf32, #tpu.memory_space<vmem>>, vector<128x128xf32>
    %1 = tpu.iota {dimensions = array<i32: 0>} : vector<128x128xi32>
    %2 = tpu.iota {dimensions = array<i32: 1>} : vector<128x128xi32>
    %3 = arith.cmpi slt, %1, %2 : vector<128x128xi32>
    %cst = arith.constant 0.000000e+00 : f32
    %4 = vector.broadcast %cst : f32 to vector<128x128xf32>
    %5 = arith.select %3, %0, %4 : vector<128x128xi1>, vector<128x128xf32>
    %c0_1 = arith.constant 0 : index
    %c0_2 = arith.constant 0 : index
    %6 = vector.load %arg0[%c0_1, %c0_2] : memref<128x128xf32, #tpu.memory_space<vmem>>, vector<128x128xf32>
    %cst_3 = arith.constant dense<0.000000e+00> : vector<128x128xf32>
    %7 = tpu.matmul %6, %5, %cst_3 {dimension_numbers = #tpu.dot_dimension_numbers<[1], [0], [0], [1], [0, 0, 1, 1], [], []>} : vector<128x128xf32>, vector<128x128xf32>, vector<128x128xf32> -> vector<128x128xf32>
    %c0_4 = arith.constant 0 : index
    %c0_5 = arith.constant 0 : index
    %8 = vector.load %arg2[%c0_4, %c0_5] : memref<128x128xf32, #tpu.memory_space<vmem>>, vector<128x128xf32>
    tpu.vector_store %arg2[%c0_4, %c0_5], %7 {strides = array<i32>} : memref<128x128xf32, #tpu.memory_space<vmem>>, vector<128x128xf32>,
    return
  }
}

module attributes {stable_mosaic.version = 11 : i64} {
  func.func @_xm_kernel(%arg0: i32, %arg1: memref<8x128xf32, #tpu.memory_space<vmem>>, %arg2: memref<128x128xf32, #tpu.memory_space<vmem>>, %arg3: memref<8x128xf32, #tpu.memory_space<vmem>>) attributes {dimension_semantics = [#tpu.dimension_semantics<parallel>], iteration_bounds = array<i64: 1>, scalar_prefetch = 0 : i64, scratch_operands = 0 : i64, tpu.core_type = #tpu.core_type<tc>, window_params = [{transform_indices = @transform_0, window_bounds = array<i64: 8, 128>}, {pipeline_mode = #tpu.pipeline_mode<synchronous>, transform_indices = @transform_1, window_bounds = array<i64: 128, 128>}, {transform_indices = @transform_2, window_bounds = array<i64: 8, 128>}]} {
    %c0 = arith.constant 0 : index
    %c0_0 = arith.constant 0 : index
    %0 = vector.load %arg1[%c0, %c0_0] : memref<8x128xf32, #tpu.memory_space<vmem>>, vector<8x128xf32>
    %c0_1 = arith.constant 0 : index
    %c0_2 = arith.constant 0 : index
    %1 = vector.load %arg2[%c0_1, %c0_2] : memref<128x128xf32, #tpu.memory_space<vmem>>, vector<128x128xf32>
    %cst = arith.constant dense<0.000000e+00> : vector<8x128xf32>
    %2 = tpu.matmul %0, %1, %cst {dimension_numbers = #tpu.dot_dimension_numbers<[1], [0], [0], [1], [0, 0, 1, 1], [], []>} : vector<8x128xf32>, vector<128x128xf32>, vector<8x128xf32> -> vector<8x128xf32>
    %c0_3 = arith.constant 0 : index
    %c0_4 = arith.constant 0 : index
    %3 = vector.load %arg3[%c0_3, %c0_4] : memref<8x128xf32, #tpu.memory_space<vmem>>, vector<8x128xf32>
    tpu.vector_store %arg3[%c0_3, %c0_4], %2 {strides = array<i32>} : memref<8x128xf32, #tpu.memory_space<vmem>>, vector<8x128xf32>,
    return
  }
  func.func @transform_0(%arg0: i32) -> (i32, i32) {
    %c0_i32 = arith.constant 0 : i32
    %c0_i32_0 = arith.constant 0 : i32
    return %arg0, %c0_i32 : i32, i32
  }
  func.func @transform_1(%arg0: i32) -> (i32, i32) {
    %c0_i32 = arith.constant 0 : i32
    %c0_i32_0 = arith.constant 0 : i32
    %c0_i32_1 = arith.constant 0 : i32
    return %c0_i32, %c0_i32_0 : i32, i32
  }
  func.func @transform_2(%arg0: i32) -> (i32, i32) {
    %c0_i32 = arith.constant 0 : i32
    %c0_i32_0 = arith.constant 0 : i32
    return %arg0, %c0_i32 : i32, i32
  }
}

</mosaic_0001>

<bundles_post_ra>
// kernel: notears_perm_forward.3
= control target key start
LH: loop header
LB: loop body
LE: loop exit
PB: predicated region body
PF: predicated region fallthrough
CT: control target
= control target key end

     0   :  { %v191_v1 = vmov 0.0   ;;  %vm192_vm0 = vmmov 0   ;;  %s263_s0 = inlined_call_operand.vmem [shape: f32[8,128], index: 0, kind: input, shape index: {}]   ;;  %s264_s1 = inlined_call_operand.vmem [shape: f32[128,128], index: 1, kind: input, shape index: {}]   ;;  %s265_s2 = inlined_call_operand.hbm [shape: f32[8,128], index: 2, kind: output, shape index: {}]  }
   0x1   :  { %v28_v0 = vld [vmem:[%s264_s1 + $0x78] sm:$0xff]  ;;  %131 = vmatprep.subr.mxu0 %v191_v1  ;;  %v27_v2 = vld [vmem:[%s264_s1 + $0x70] sm:$0xff]  ;;  %163 = vmatprep.mubr.msk.f32.mxu0 %vm192_vm0, %v191_v1  ;;  %v26_v3 = vld [vmem:[%s264_s1 + $0x68] sm:$0xff] }
   0x2   :  { %132 = vmatpush3.msra.mxu0 %v28_v0  ;;  %v25_v4 = vld [vmem:[%s264_s1 + $0x60] sm:$0xff] }
   0x3   :  { %133 = vmatprep.subr.mxu0 %v191_v1 }
   0x4   :  { %134 = vmatpush3.msra.mxu0 %v27_v2 }
   0x5   :  { %135 = vmatprep.subr.mxu0 %v191_v1 }
   0x6   :  { %7 = vsyncpa [#allocation3], 0  ;;  %136 = vmatpush3.msra.mxu0 %v26_v3  ;;  %v24_v5 = vld [vmem:[%s264_s1 + $0x58] sm:$0xff]  ;;  %v23_v6 = vld [vmem:[%s264_s1 + $0x50] sm:$0xff]  ;;  %s193_s15 = smov [#allocation2]  }
   0x7   :  { %137 = vmatprep.subr.mxu0 %v191_v1  ;;  %v22_v7 = vld [vmem:[%s264_s1 + $0x48] sm:$0xff]  ;;  %v21_v8 = vld [vmem:[%s264_s1 + $0x40] sm:$0xff]  ;;  %v20_v9 = vld [vmem:[%s264_s1 + $0x38] sm:$0xff]  ;;  %s106_s16 = sshll.u32 %s193_s15, 4  ;;  %s107_s16 = int_to_ptr.vmem [resolvable:$true] %s106_s16 }
   0x8   :  { %138 = vmatpush3.msra.mxu0 %v25_v4  ;;  %v19_v10 = vld [vmem:[%s264_s1 + $0x30] sm:$0xff]  ;;  %v18_v11 = vld [vmem:[%s264_s1 + $0x28] sm:$0xff]  ;;  %v17_v12 = vld [vmem:[%s264_s1 + $0x20] sm:$0xff]  ;;  %s169_s17 = scalar_lea.vmem %s107_s16, 128  ;;  %p174_p1 = scmp.lt.s32.totalorder %s107_s16, %s107_s16 }
   0x9   :  { %139 = vmatprep.subr.mxu0 %v191_v1  ;;  %v16_v13 = vld [vmem:[%s264_s1 + $0x18] sm:$0xff]  ;;  %v15_v14 = vld [vmem:[%s264_s1 + $0x10] sm:$0xff]  ;;  %v14_v15 = vld [vmem:[%s264_s1 + $0x8] sm:$0xff]  ;;  %p170_p0 = scmp.ne.s32.totalorder %s107_s16, %s169_s17  ;;  %p175_p2 = scmp.lt.s32.totalorder %s169_s17, %s169_s17 }
   0xa   :  { %140 = vmatpush3.msra.mxu0 %v24_v5  ;;  %v13_v16 = vld [vmem:[%s264_s1] sm:$0xff] }
   0xb   :  { %141 = vmatprep.subr.mxu0 %v191_v1  ;;  %v12_v17 = vld [vmem:[%s263_s0] sm:$0xff]  ;;  %p176_p3 = por %p175_p2, %p174_p1 }
   0xc   :  { %142 = vmatpush3.msra.mxu0 %v23_v6 }
   0xd   :  { %143 = vmatprep.subr.mxu0 %v191_v1  ;;  %p177_p4 = pnand %p176_p3, %p170_p0 }
   0xe   :  { %144 = vmatpush3.msra.mxu0 %v22_v7 }
   0xf   :  { %145 = vmatprep.subr.mxu0 %v191_v1 }
  0x10   :  { %146 = vmatpush3.msra.mxu0 %v21_v8 }
  0x11   :  { %147 = vmatprep.subr.mxu0 %v191_v1 }
  0x12   :  { %148 = vmatpush3.msra.mxu0 %v20_v9 }
  0x13   :  { %149 = vmatprep.subr.mxu0 %v191_v1 }
  0x14   :  { %150 = vmatpush3.msra.mxu0 %v19_v10 }
  0x15   :  { %151 = vmatprep.subr.mxu0 %v191_v1 }
  0x16   :  { %152 = vmatpush3.msra.mxu0 %v18_v11 }
  0x17   :  { %153 = vmatprep.subr.mxu0 %v191_v1 }
  0x18   :  { %154 = vmatpush3.msra.mxu0 %v17_v12 }
  0x19   :  { %155 = vmatprep.subr.mxu0 %v191_v1 }
  0x1a   :  { %156 = vmatpush3.msra.mxu0 %v16_v13 }
  0x1b   :  { %157 = vmatprep.subr.mxu0 %v191_v1 }
  0x1c   :  { %158 = vmatpush3.msra.mxu0 %v15_v14 }
  0x1d   :  { %159 = vmatprep.subr.mxu0 %v191_v1 }
  0x1e   :  { %160 = vmatpush3.msra.mxu0 %v14_v15 }
  0x1f   :  { %161 = vmatprep.subr.mxu0 %v191_v1 }
  0x20   :  { %162 = vmatpush3.msra.mxu0 %v13_v16 }
  0x21   :  { %164 = vmatmul.mubr.f32.vlgmr.msra.gmra.mxu0 %v12_v17 }
  0xe1   :  { %v95_v18 = vpop.f32.mrf.mxu0 }
  0xe2   :  { %99 = vst [vmem:[#allocation2] sm:$0xff] %v95_v18 }
  0xe3   :  { %v165_v19 = vpop.f32.mrf.mxu0 }
  0xe4   :  { %180 = shalt.err (!%p177_p4)
}
  0xe5   :  { %109 = dma.vmem_to_hbm [thread:$0]  %s107_s16, 128, %s265_s2, [#allocation3]  }
  0xe6   :  { %189 = dma.done.wait [#allocation3], 128  }
  0xe7   :  { %190 = vsyncadd [#allocation3], 4294967168 }
  0xe8   :  { %113 = vsyncpa [#allocation3], 1 }

// kernel: notears_perm_forward.2
= control target key start
LH: loop header
LB: loop body
LE: loop exit
PB: predicated region body
PF: predicated region fallthrough
CT: control target
= control target key end

     0   :  { %v27_v0 = vlaneseq  ;;  %s590_s1 = inlined_call_operand.vmem [shape: f32[128,128], index: 1, kind: input, shape index: {}]   ;;  %s591_s0 = inlined_call_operand.vmem [shape: f32[128,128], index: 0, kind: input, shape index: {}]   ;;  %s592_s2 = inlined_call_operand.vmem [shape: f32[128,128], index: 2, kind: output, shape index: {}]  }
   0x1   :  { %v26_v3 = vld [vmem:[%s590_s1 + $0x78] sm:$0xff]  ;;  %v25_v7 = vld [vmem:[%s590_s1 + $0x70] sm:$0xff]  ;;  %v24_v9 = vld [vmem:[%s590_s1 + $0x68] sm:$0xff] }
   0x2   :  { %v410_v1 = vshrl.u32 %v27_v0, 7  ;;  %v412_v2 = vand.u32 127, %v27_v0  ;;  %v23_v11 = vld [vmem:[%s590_s1 + $0x60] sm:$0xff]  ;;  %v22_v13 = vld [vmem:[%s590_s1 + $0x58] sm:$0xff]  ;;  %v21_v15 = vld [vmem:[%s590_s1 + $0x50] sm:$0xff] }
   0x3   :  { %v20_v17 = vld [vmem:[%s590_s1 + $0x48] sm:$0xff]  ;;  %v19_v19 = vld [vmem:[%s590_s1 + $0x40] sm:$0xff]  ;;  %v18_v21 = vld [vmem:[%s590_s1 + $0x38] sm:$0xff] }
   0x4   :  { %v43_v4 = vadd.s32 120, %v410_v1  ;;  %v42_v5 = vadd.s32 112, %v410_v1  ;;  %v41_v6 = vadd.s32 104, %v410_v1  ;;  %v40_v8 = vadd.s32 96, %v410_v1  ;;  %v17_v23 = vld [vmem:[%s590_s1 + $0x30] sm:$0xff]  ;;  %v16_v25 = vld [vmem:[%s590_s1 + $0x28] sm:$0xff] }
   0x5   :  { %v39_v10 = vadd.s32 88, %v410_v1  ;;  %v38_v12 = vadd.s32 80, %v410_v1  ;;  %v37_v14 = vadd.s32 72, %v410_v1  ;;  %v36_v16 = vadd.s32 64, %v410_v1  ;;  %v15_v27 = vld [vmem:[%s590_s1 + $0x20] sm:$0xff]  ;;  %v14_v29 = vld [vmem:[%s590_s1 + $0x18] sm:$0xff] }
   0x6   :  { %vm61_vm0 = vcmp.lt.s32.totalorder %v43_v4, %v412_v2  ;;  %vm60_vm1 = vcmp.lt.s32.totalorder %v42_v5, %v412_v2  ;;  %vm59_vm2 = vcmp.lt.s32.totalorder %v41_v6, %v412_v2  ;;  %vm58_vm3 = vcmp.lt.s32.totalorder %v40_v8, %v412_v2  ;;  %v13_v31 = vld [vmem:[%s590_s1 + $0x10] sm:$0xff]  ;;  %v12_v32 = vld [vmem:[%s590_s1 + $0x8] sm:$0xff]  ;;  %v11_v33 = vld [vmem:[%s590_s1] sm:$0xff] }
   0x7   :  { %307 = vmatprep.subr.msk.mxu0 %vm61_vm0, %v26_v3  ;;  %363 = vmatprep.subr.msk.mxu1 %vm61_vm0, %v26_v3  ;;  %vm57_vm4 = vcmp.lt.s32.totalorder %v39_v10, %v412_v2  ;;  %vm56_vm5 = vcmp.lt.s32.totalorder %v38_v12, %v412_v2  ;;  %vm55_vm6 = vcmp.lt.s32.totalorder %v37_v14, %v412_v2  ;;  %v35_v18 = vadd.s32 56, %v410_v1  ;;  %v78_v34 = vld [vmem:[%s591_s0] sm:$0xff]  ;;  %v79_v36 = vld [vmem:[%s591_s0 + $0x8] sm:$0xff]  ;;  %v80_v38 = vld [vmem:[%s591_s0 + $0x10] sm:$0xff] }
   0x8   :  { %308 = vmatpush3.msk.msra.mxu0 %vm61_vm0, %v26_v3  ;;  %379 = vmatpush3.msk.msra.mxu1 %vm61_vm0, %v26_v3  ;;  %vm54_vm7 = vcmp.lt.s32.totalorder %v36_v16, %v412_v2  ;;  %v34_v20 = vadd.s32 48, %v410_v1  ;;  %v33_v22 = vadd.s32 40, %v410_v1  ;;  %v32_v24 = vadd.s32 32, %v410_v1  ;;  %v86_v35 = vld [vmem:[%s591_s0 + $0x40] sm:$0xff]  ;;  %v87_v37 = vld [vmem:[%s591_s0 + $0x48] sm:$0xff]  ;;  %v88_v39 = vld [vmem:[%s591_s0 + $0x50] sm:$0xff] }
   0x9   :  { %309 = vmatprep.subr.msk.mxu0 %vm60_vm1, %v25_v7  ;;  %364 = vmatprep.subr.msk.mxu1 %vm60_vm1, %v25_v7  ;;  %vm53_vm8 = vcmp.lt.s32.totalorder %v35_v18, %v412_v2  ;;  %v31_v26 = vadd.s32 24, %v410_v1  ;;  %v30_v28 = vadd.s32 16, %v410_v1  ;;  %v29_v30 = vadd.s32 8, %v410_v1  ;;  %v81_v40 = vld [vmem:[%s591_s0 + $0x18] sm:$0xff]  ;;  %v82_v42 = vld [vmem:[%s591_s0 + $0x20] sm:$0xff]  ;;  %v83_v44 = vld [vmem:[%s591_s0 + $0x28] sm:$0xff] }
   0xa   :  { %310 = vmatpush3.msk.msra.mxu0 %vm60_vm1, %v25_v7  ;;  %380 = vmatpush3.msk.msra.mxu1 %vm60_vm1, %v25_v7  ;;  %vm52_vm9 = vcmp.lt.s32.totalorder %v34_v20, %v412_v2  ;;  %vm51_vm10 = vcmp.lt.s32.totalorder %v33_v22, %v412_v2  ;;  %vm50_vm11 = vcmp.lt.s32.totalorder %v32_v24, %v412_v2  ;;  %v89_v41 = vld [vmem:[%s591_s0 + $0x58] sm:$0xff]  ;;  %v90_v43 = vld [vmem:[%s591_s0 + $0x60] sm:$0xff]  ;;  %v91_v45 = vld [vmem:[%s591_s0 + $0x68] sm:$0xff] }
   0xb   :  { %311 = vmatprep.subr.msk.mxu0 %vm59_vm2, %v24_v9  ;;  %365 = vmatprep.subr.msk.mxu1 %vm59_vm2, %v24_v9  ;;  %vm49_vm12 = vcmp.lt.s32.totalorder %v31_v26, %v412_v2  ;;  %vm48_vm13 = vcmp.lt.s32.totalorder %v30_v28, %v412_v2  ;;  %vm47_vm14 = vcmp.lt.s32.totalorder %v29_v30, %v412_v2  ;;  %v84_v46 = vld [vmem:[%s591_s0 + $0x30] sm:$0xff]  ;;  %v85_v48 = vld [vmem:[%s591_s0 + $0x38] sm:$0xff] }
   0xc   :  { %312 = vmatpush3.msk.msra.mxu0 %vm59_vm2, %v24_v9  ;;  %381 = vmatpush3.msk.msra.mxu1 %vm59_vm2, %v24_v9  ;;  %vm46_vm15 = vcmp.lt.s32.totalorder %v410_v1, %v412_v2  ;;  %v92_v47 = vld [vmem:[%s591_s0 + $0x70] sm:$0xff]  ;;  %v93_v49 = vld [vmem:[%s591_s0 + $0x78] sm:$0xff] }
   0xd   :  { %313 = vmatprep.subr.msk.mxu0 %vm58_vm3, %v23_v11  ;;  %366 = vmatprep.subr.msk.mxu1 %vm58_vm3, %v23_v11 }
   0xe   :  { %314 = vmatpush3.msk.msra.mxu0 %vm58_vm3, %v23_v11  ;;  %382 = vmatpush3.msk.msra.mxu1 %vm58_vm3, %v23_v11 }
   0xf   :  { %315 = vmatprep.subr.msk.mxu0 %vm57_vm4, %v22_v13  ;;  %367 = vmatprep.subr.msk.mxu1 %vm57_vm4, %v22_v13 }
  0x10   :  { %316 = vmatpush3.msk.msra.mxu0 %vm57_vm4, %v22_v13  ;;  %383 = vmatpush3.msk.msra.mxu1 %vm57_vm4, %v22_v13 }
  0x11   :  { %317 = vmatprep.subr.msk.mxu0 %vm56_vm5, %v21_v15  ;;  %368 = vmatprep.subr.msk.mxu1 %vm56_vm5, %v21_v15 }
  0x12   :  { %318 = vmatpush3.msk.msra.mxu0 %vm56_vm5, %v21_v15  ;;  %384 = vmatpush3.msk.msra.mxu1 %vm56_vm5, %v21_v15 }
  0x13   :  { %319 = vmatprep.subr.msk.mxu0 %vm55_vm6, %v20_v17  ;;  %369 = vmatprep.subr.msk.mxu1 %vm55_vm6, %v20_v17 }
  0x14   :  { %320 = vmatpush3.msk.msra.mxu0 %vm55_vm6, %v20_v17  ;;  %385 = vmatpush3.msk.msra.mxu1 %vm55_vm6, %v20_v17 }
  0x15   :  { %321 = vmatprep.subr.msk.mxu0 %vm54_vm7, %v19_v19  ;;  %370 = vmatprep.subr.msk.mxu1 %vm54_vm7, %v19_v19 }
  0x16   :  { %322 = vmatpush3.msk.msra.mxu0 %vm54_vm7, %v19_v19  ;;  %386 = vmatpush3.msk.msra.mxu1 %vm54_vm7, %v19_v19 }
  0x17   :  { %323 = vmatprep.subr.msk.mxu0 %vm53_vm8, %v18_v21  ;;  %371 = vmatprep.subr.msk.mxu1 %vm53_vm8, %v18_v21 }
  0x18   :  { %324 = vmatpush3.msk.msra.mxu0 %vm53_vm8, %v18_v21  ;;  %387 = vmatpush3.msk.msra.mxu1 %vm53_vm8, %v18_v21 }
  0x19   :  { %325 = vmatprep.subr.msk.mxu0 %vm52_vm9, %v17_v23  ;;  %372 = vmatprep.subr.msk.mxu1 %vm52_vm9, %v17_v23 }
  0x1a   :  { %326 = vmatpush3.msk.msra.mxu0 %vm52_vm9, %v17_v23  ;;  %388 = vmatpush3.msk.msra.mxu1 %vm52_vm9, %v17_v23 }
  0x1b   :  { %327 = vmatprep.subr.msk.mxu0 %vm51_vm10, %v16_v25  ;;  %373 = vmatprep.subr.msk.mxu1 %vm51_vm10, %v16_v25 }
  0x1c   :  { %328 = vmatpush3.msk.msra.mxu0 %vm51_vm10, %v16_v25  ;;  %389 = vmatpush3.msk.msra.mxu1 %vm51_vm10, %v16_v25 }
  0x1d   :  { %329 = vmatprep.subr.msk.mxu0 %vm50_vm11, %v15_v27  ;;  %374 = vmatprep.subr.msk.mxu1 %vm50_vm11, %v15_v27 }
  0x1e   :  { %330 = vmatpush3.msk.msra.mxu0 %vm50_vm11, %v15_v27  ;;  %390 = vmatpush3.msk.msra.mxu1 %vm50_vm11, %v15_v27 }
  0x1f   :  { %331 = vmatprep.subr.msk.mxu0 %vm49_vm12, %v14_v29  ;;  %375 = vmatprep.subr.msk.mxu1 %vm49_vm12, %v14_v29 }
  0x20   :  { %332 = vmatpush3.msk.msra.mxu0 %vm49_vm12, %v14_v29  ;;  %391 = vmatpush3.msk.msra.mxu1 %vm49_vm12, %v14_v29 }
  0x21   :  { %333 = vmatprep.subr.msk.mxu0 %vm48_vm13, %v13_v31  ;;  %376 = vmatprep.subr.msk.mxu1 %vm48_vm13, %v13_v31 }
  0x22   :  { %334 = vmatpush3.msk.msra.mxu0 %vm48_vm13, %v13_v31  ;;  %392 = vmatpush3.msk.msra.mxu1 %vm48_vm13, %v13_v31 }
  0x23   :  { %335 = vmatprep.subr.msk.mxu0 %vm47_vm14, %v12_v32  ;;  %377 = vmatprep.subr.msk.mxu1 %vm47_vm14, %v12_v32 }
  0x24   :  { %336 = vmatpush3.msk.msra.mxu0 %vm47_vm14, %v12_v32  ;;  %393 = vmatpush3.msk.msra.mxu1 %vm47_vm14, %v12_v32 }
  0x25   :  { %337 = vmatprep.subr.msk.mxu0 %vm46_vm15, %v11_v33  ;;  %378 = vmatprep.subr.msk.mxu1 %vm46_vm15, %v11_v33 }
  0x26   :  { %338 = vmatpush3.msk.msra.mxu0 %vm46_vm15, %v11_v33  ;;  %394 = vmatpush3.msk.msra.mxu1 %vm46_vm15, %v11_v33 }
  0x27   :  { %339 = vmatprep.mubr.f32.mxu0 %v78_v34  ;;  %351 = vmatprep.mubr.f32.mxu1 %v86_v35 }
  0x28   :  { %340 = vmatmul.mubr.f32.vlgmr.msra.gmra.mxu0 %v79_v36  ;;  %352 = vmatmul.mubr.f32.vlgmr.msra.gmra.mxu1 %v87_v37 }
  0x29   :  { %342 = vmatprep.mubr.f32.mxu0 %v80_v38  ;;  %354 = vmatprep.mubr.f32.mxu1 %v88_v39 }
  0x2c   :  { %343 = vmatmul.mubr.f32.gmra.mxu0 %v81_v40  ;;  %355 = vmatmul.mubr.f32.gmra.mxu1 %v89_v41 }
  0x2d   :  { %345 = vmatprep.mubr.f32.mxu0 %v82_v42  ;;  %357 = vmatprep.mubr.f32.mxu1 %v90_v43 }
  0x30   :  { %346 = vmatmul.mubr.f32.gmra.mxu0 %v83_v44  ;;  %358 = vmatmul.mubr.f32.gmra.mxu1 %v91_v45 }
  0x31   :  { %348 = vmatprep.mubr.f32.mxu0 %v84_v46  ;;  %360 = vmatprep.mubr.f32.mxu1 %v92_v47 }
  0x34   :  { %349 = vmatmul.mubr.f32.gmra.mxu0 %v85_v48  ;;  %361 = vmatmul.mubr.f32.gmra.mxu1 %v93_v49 }
  0xe8   :  { %v341_v50 = vpop.f32.mrf.mxu0  ;;  %v353_v51 = vpop.f32.mrf.mxu1 }
  0xe9   :  { %240 = vst [vmem:[%s592_s2 + $0x8] sm:$0xff] %v341_v50  ;;  %248 = vst [vmem:[%s592_s2 + $0x48] sm:$0xff] %v353_v51 }
  0xea   :  { %v160_v52 = vpop.f32.mrf.mxu0  ;;  %v200_v53 = vpop.f32.mrf.mxu1 }
  0xeb   :  { %239 = vst [vmem:[%s592_s2] sm:$0xff] %v160_v52  ;;  %247 = vst [vmem:[%s592_s2 + $0x40] sm:$0xff] %v200_v53 }
  0xec   :  { %v344_v54 = vpop.f32.mrf.mxu0  ;;  %v356_v55 = vpop.f32.mrf.mxu1 }
  0xed   :  { %242 = vst [vmem:[%s592_s2 + $0x18] sm:$0xff] %v344_v54  ;;  %250 = vst [vmem:[%s592_s2 + $0x58] sm:$0xff] %v356_v55 }
  0xee   :  { %v170_v56 = vpop.f32.mrf.mxu0  ;;  %v210_v57 = vpop.f32.mrf.mxu1 }
  0xef   :  { %241 = vst [vmem:[%s592_s2 + $0x10] sm:$0xff] %v170_v56  ;;  %249 = vst [vmem:[%s592_s2 + $0x50] sm:$0xff] %v210_v57 }
  0xf0   :  { %v347_v58 = vpop.f32.mrf.mxu0  ;;  %v359_v59 = vpop.f32.mrf.mxu1 }
  0xf1   :  { %244 = vst [vmem:[%s592_s2 + $0x28] sm:$0xff] %v347_v58  ;;  %252 = vst [vmem:[%s592_s2 + $0x68] sm:$0xff] %v359_v59 }
  0xf2   :  { %v180_v60 = vpop.f32.mrf.mxu0  ;;  %v220_v61 = vpop.f32.mrf.mxu1 }
  0xf3   :  { %243 = vst [vmem:[%s592_s2 + $0x20] sm:$0xff] %v180_v60  ;;  %251 = vst [vmem:[%s592_s2 + $0x60] sm:$0xff] %v220_v61 }
  0xf4   :  { %v350_v62 = vpop.f32.mrf.mxu0  ;;  %v362_v63 = vpop.f32.mrf.mxu1 }
  0xf5   :  { %246 = vst [vmem:[%s592_s2 + $0x38] sm:$0xff] %v350_v62  ;;  %254 = vst [vmem:[%s592_s2 + $0x78] sm:$0xff] %v362_v63 }
  0xf6   :  { %v190_v0 = vpop.f32.mrf.mxu0  ;;  %v230_v1 = vpop.f32.mrf.mxu1 }
  0xf7   :  { %245 = vst [vmem:[%s592_s2 + $0x30] sm:$0xff] %v190_v0  ;;  %253 = vst [vmem:[%s592_s2 + $0x70] sm:$0xff] %v230_v1 }

</bundles_post_ra>
